<compile_context>
chip_gen: v7x
topology: tpu7x:2x2x1
jax: 0.10.0
libtpu: 0.0.40
codegen_flags: <defaults>
</compile_context>

<pallas_src>
import functools

import jax
import jax.numpy as jnp
from jax.experimental import pallas as pl
from jax.experimental.pallas import tpu as pltpu


# ---------------------------------------------------------------------------
# Small helpers
# ---------------------------------------------------------------------------
_VMEM_BUDGET = 20 * 1024 * 1024  # per-kernel resident budget (< 32 MiB scoped default)


def _round_up(x, m):
    return ((x + m - 1) // m) * m


def _cpad(c):
    """Lane-dense channel count: 64 -> 128; everything else in ResNet-50 is %128."""
    return 128 if c == 64 else c


def _apply_act(y, act):
    if act == "relu":
        return jnp.maximum(y, 0.0)
    if act == "swish":
        return y * jax.nn.sigmoid(y)
    return y


def _resident_bytes(TM, TK, TN, multi_k):
    b = 2 * TM * TK * 2          # x tile, double buffered, bf16
    b += 2 * TK * TN * 2         # w tile, double buffered, bf16
    b += 2 * TM * TN * 2         # out tile, double buffered, bf16
    b += 2 * TM * TN * 2         # (optional) residual tile, conservative
    b += 2 * TN * 4              # shift
    if multi_k:
        b += TM * TN * 4         # f32 accumulator scratch
    return b


def _choose_tiles(M, K, N):
    """Return (Mp, TM, Kp, TK, TN). Single K step whenever the budget allows."""
    Mp = _round_up(M, 8)
    TM = min(256, Mp)
    Mp = _round_up(Mp, TM)
    TN = min(512, N)

    Kp = _round_up(K, 128)
    TK = Kp
    if _resident_bytes(TM, Kp, TN, False) > _VMEM_BUDGET:
        TK = None
        for cand in (1024, 768, 512, 384, 256, 128):
            Kq = _round_up(K, cand)
            if _resident_bytes(TM, cand, TN, Kq // cand > 1) <= _VMEM_BUDGET:
                Kp, TK = Kq, cand
                break
        if TK is None:
            Kp, TK = _round_up(K, 128), 128

    # v7x megacore: keep >= 2 points on the parallel axes (halve TN when possible).
    while (Mp // TM) * (N // TN) < 2 and TN > 128 and (TN // 2) % 128 == 0:
        TN //= 2
    return Mp, TM, Kp, TK, TN


# ---------------------------------------------------------------------------
# Pallas kernels
# ---------------------------------------------------------------------------
def _mm1_kernel(x_ref, w_ref, sh_ref, o_ref, *, act):
    """Single-K-step matmul: act(x @ w + shift)."""
    y = jnp.dot(x_ref[...], w_ref[...], preferred_element_type=jnp.float32)
    y = y + sh_ref[...]
    o_ref[...] = _apply_act(y, act).astype(o_ref.dtype)


def _mm1_res_kernel(x_ref, w_ref, sh_ref, r_ref, o_ref, *, act):
    """Single-K-step matmul with fused residual add (f32 epilogue)."""
    y = jnp.dot(x_ref[...], w_ref[...], preferred_element_type=jnp.float32)
    y = y + sh_ref[...] + r_ref[...].astype(jnp.float32)
    o_ref[...] = _apply_act(y, act).astype(o_ref.dtype)


def _mm_kernel(x_ref, w_ref, sh_ref, o_ref, acc_ref, *, act):
    """Multi-K-step matmul with f32 VMEM accumulator."""
    @pl.when(pl.program_id(2) == 0)
    def _():
        acc_ref[...] = jnp.zeros_like(acc_ref)

    acc_ref[...] += jnp.dot(x_ref[...], w_ref[...],
                            preferred_element_type=jnp.float32)

    @pl.when(pl.program_id(2) == pl.num_programs(2) - 1)
    def _():
        y = acc_ref[...] + sh_ref[...]
        o_ref[...] = _apply_act(y, act).astype(o_ref.dtype)


def _mm_res_kernel(x_ref, w_ref, sh_ref, r_ref, o_ref, acc_ref, *, act):
    @pl.when(pl.program_id(2) == 0)
    def _():
        acc_ref[...] = jnp.zeros_like(acc_ref)

    acc_ref[...] += jnp.dot(x_ref[...], w_ref[...],
                            preferred_element_type=jnp.float32)

    @pl.when(pl.program_id(2) == pl.num_programs(2) - 1)
    def _():
        y = acc_ref[...] + sh_ref[...] + r_ref[...].astype(jnp.float32)
        o_ref[...] = _apply_act(y, act).astype(o_ref.dtype)


def _mm_dual_kernel(x1_ref, w1_ref, x2_ref, w2_ref, sh_ref, o_ref, *, act):
    """Fused conv3 + downsample 1x1: act(x1 @ w1 + x2 @ w2 + shift), f32 accumulate."""
    y = jnp.dot(x1_ref[...], w1_ref[...], preferred_element_type=jnp.float32)
    y = y + jnp.dot(x2_ref[...], w2_ref[...], preferred_element_type=jnp.float32)
    y = y + sh_ref[...]
    o_ref[...] = _apply_act(y, act).astype(o_ref.dtype)


def _head_kernel(x_ref, w1_ref, sh1_ref, w2_ref, sh2_ref, wh_ref, bh_ref, o_ref):
    """Fused: global average pool -> Linear+BN+Swish -> Linear+BN+Swish -> 9 heads."""
    feat = jnp.mean(x_ref[...].astype(jnp.float32), axis=1)          # (Np, 2048)
    h = jnp.dot(feat.astype(jnp.bfloat16), w1_ref[...],
                preferred_element_type=jnp.float32) + sh1_ref[...]
    h = h * jax.nn.sigmoid(h)                                         # swish
    h = jnp.dot(h.astype(jnp.bfloat16), w2_ref[...],
                preferred_element_type=jnp.float32) + sh2_ref[...]
    h = h * jax.nn.sigmoid(h)                                         # swish
    y = jnp.dot(h.astype(jnp.bfloat16), wh_ref[...],
                preferred_element_type=jnp.float32) + bh_ref[...]
    o_ref[...] = y


# ---------------------------------------------------------------------------
# Pallas wrappers
# ---------------------------------------------------------------------------
def fused_matmul(x, w, shift, *, act="none", residual=None,
                 out_dtype=jnp.bfloat16):
    """act((x @ w) + shift [+ residual]) — bf16 operands, f32 accumulation."""
    M, K = x.shape
    _, N0 = w.shape

    # lane-dense N
    N = _round_up(N0, 128)
    wb = w.astype(jnp.bfloat16)
    sh = jnp.asarray(shift, jnp.float32).reshape(1, -1)
    if N != N0:
        wb = jnp.pad(wb, ((0, 0), (0, N - N0)))
        sh = jnp.pad(sh, ((0, 0), (0, N - N0)))

    Mp, TM, Kp, TK, TN = _choose_tiles(M, K, N)

    xb = x.astype(jnp.bfloat16)
    if (Mp, Kp) != (M, K):
        xb = jnp.pad(xb, ((0, Mp - M), (0, Kp - K)))
    if Kp != K:
        wb = jnp.pad(wb, ((0, Kp - K), (0, 0)))

    rb = None
    if residual is not None:
        rb = residual.astype(jnp.bfloat16)
        if Mp != M:
            rb = jnp.pad(rb, ((0, Mp - M), (0, 0)))
        if N != N0:
            rb = jnp.pad(rb, ((0, 0), (0, N - N0)))

    ce = pl.CostEstimate(flops=2 * Mp * Kp * N, transcendentals=0,
                         bytes_accessed=Mp * Kp * 2 + Kp * N * 2 + 2 * Mp * N * 2)

    single = (TK == Kp)
    if single:
        grid = (Mp // TM, N // TN)
        in_specs = [pl.BlockSpec((TM, Kp), lambda i, j: (i, 0)),
                    pl.BlockSpec((Kp, TN), lambda i, j: (0, j)),
                    pl.BlockSpec((1, TN), lambda i, j: (0, j))]
        out_spec = pl.BlockSpec((TM, TN), lambda i, j: (i, j))
        dims = ("parallel", "parallel")
        scratch = []
        args = [xb, wb, sh]
        if rb is not None:
            in_specs.append(pl.BlockSpec((TM, TN), lambda i, j: (i, j)))
            args.append(rb)
            kernel = functools.partial(_mm1_res_kernel, act=act)
        else:
            kernel = functools.partial(_mm1_kernel, act=act)
    else:
        grid = (Mp // TM, N // TN, Kp // TK)
        in_specs = [pl.BlockSpec((TM, TK), lambda i, j, k: (i, k)),
                    pl.BlockSpec((TK, TN), lambda i, j, k: (k, j)),
                    pl.BlockSpec((1, TN), lambda i, j, k: (0, j))]
        out_spec = pl.BlockSpec((TM, TN), lambda i, j, k: (i, j))
        dims = ("parallel", "parallel", "arbitrary")
        scratch = [pltpu.VMEM((TM, TN), jnp.float32)]
        args = [xb, wb, sh]
        if rb is not None:
            in_specs.append(pl.BlockSpec((TM, TN), lambda i, j, k: (i, j)))
            args.append(rb)
            kernel = functools.partial(_mm_res_kernel, act=act)
        else:
            kernel = functools.partial(_mm_kernel, act=act)

    out = pl.pallas_call(
        kernel,
        out_shape=jax.ShapeDtypeStruct((Mp, N), out_dtype),
        grid_spec=pltpu.PrefetchScalarGridSpec(
            num_scalar_prefetch=0,
            grid=grid,
            in_specs=in_specs,
            out_specs=out_spec,
            scratch_shapes=scratch,
        ),
        compiler_params=pltpu.CompilerParams(dimension_semantics=dims),
        cost_estimate=ce,
    )(*args)
    out = out[:M]
    if N != N0:
        out = out[:, :N0]
    return out


def fused_dual_matmul(x1, w1, x2, w2, shift, *, act="relu",
                      out_dtype=jnp.bfloat16):
    """act(x1 @ w1 + x2 @ w2 + shift): conv3 + downsample 1x1 sharing one epilogue.

    Returns None when the two K dims do not fit a single-step VMEM budget
    (never happens for ResNet-50); the caller then falls back to two kernels.
    """
    M, K1 = x1.shape
    M2, K2 = x2.shape
    N = w1.shape[1]
    assert M == M2 and w2.shape[1] == N and N % 128 == 0

    Mp = _round_up(M, 8)
    TM = min(256, Mp)
    Mp = _round_up(Mp, TM)
    K1p = _round_up(K1, 128)
    K2p = _round_up(K2, 128)
    TN = min(512, N)
    while (Mp // TM) * (N // TN) < 2 and TN > 128 and (TN // 2) % 128 == 0:
        TN //= 2

    resident = (2 * TM * (K1p + K2p) * 2 + 2 * (K1p + K2p) * TN * 2
                + 2 * TM * TN * 2 + 2 * TN * 4)
    if resident > _VMEM_BUDGET:
        return None

    def prep_x(x, Kp):
        xb = x.astype(jnp.bfloat16)
        m, k = x.shape
        if (Mp, Kp) != (m, k):
            xb = jnp.pad(xb, ((0, Mp - m), (0, Kp - k)))
        return xb

    x1b, x2b = prep_x(x1, K1p), prep_x(x2, K2p)
    w1b = w1.astype(jnp.bfloat16)
    w2b = w2.astype(jnp.bfloat16)
    if K1p != K1:
        w1b = jnp.pad(w1b, ((0, K1p - K1), (0, 0)))
    if K2p != K2:
        w2b = jnp.pad(w2b, ((0, K2p - K2), (0, 0)))
    sh = jnp.asarray(shift, jnp.float32).reshape(1, N)

    ce = pl.CostEstimate(
        flops=2 * Mp * (K1p + K2p) * N, transcendentals=0,
        bytes_accessed=Mp * (K1p + K2p) * 2 + (K1p + K2p) * N * 2 + Mp * N * 2)

    out = pl.pallas_call(
        functools.partial(_mm_dual_kernel, act=act),
        out_shape=jax.ShapeDtypeStruct((Mp, N), out_dtype),
        grid_spec=pltpu.PrefetchScalarGridSpec(
            num_scalar_prefetch=0,
            grid=(Mp // TM, N // TN),
            in_specs=[pl.BlockSpec((TM, K1p), lambda i, j: (i, 0)),
                      pl.BlockSpec((K1p, TN), lambda i, j: (0, j)),
                      pl.BlockSpec((TM, K2p), lambda i, j: (i, 0)),
                      pl.BlockSpec((K2p, TN), lambda i, j: (0, j)),
                      pl.BlockSpec((1, TN), lambda i, j: (0, j))],
            out_specs=pl.BlockSpec((TM, TN), lambda i, j: (i, j)),
        ),
        compiler_params=pltpu.CompilerParams(
            dimension_semantics=("parallel", "parallel")),
        cost_estimate=ce,
    )(x1b, w1b, x2b, w2b, sh)
    return out[:M]


def _extract_patches(x, kh, kw, stride, pad):
    """im2col for NHWC input (bf16); feature order is (kh, kw, Cin)."""
    N, H, W, C = x.shape
    Ho = (H + 2 * pad - kh) // stride + 1
    Wo = (W + 2 * pad - kw) // stride + 1
    xp = jnp.pad(x, ((0, 0), (pad, pad), (pad, pad), (0, 0)))
    cols = []
    for i in range(kh):
        for j in range(kw):
            cols.append(xp[:, i:i + (Ho - 1) * stride + 1:stride,
                           j:j + (Wo - 1) * stride + 1:stride, :])
    patches = jnp.concatenate(cols, axis=-1)          # (N, Ho, Wo, kh*kw*C)
    return patches.reshape(N * Ho * Wo, kh * kw * C), (N, Ho, Wo)


def conv_prepared(x, w2d, shift, *, kh, kw, stride, pad, act, residual=None):
    """Conv (as matmul) with BN scale pre-folded into w2d; shift is the BN bias."""
    N, H, W, C = x.shape
    if kh == 1 and kw == 1:
        xs = x[:, ::stride, ::stride, :] if stride > 1 else x
        Ho, Wo = xs.shape[1], xs.shape[2]
        patches = xs.reshape(N * Ho * Wo, C)
    else:
        patches, (N, Ho, Wo) = _extract_patches(x, kh, kw, stride, pad)
    cout = w2d.shape[1]
    res2d = residual.reshape(N * Ho * Wo, cout) if residual is not None else None
    out = fused_matmul(patches, w2d, shift, act=act, residual=res2d,
                       out_dtype=jnp.bfloat16)
    return out.reshape(N, Ho, Wo, cout)


def maxpool2d_3x3_s2(x):
    """3x3/stride-2 max pool in XLA (fused slice+max; input is post-ReLU >= 0,
    so zero padding is equivalent to -inf padding)."""
    N, H, W, C = x.shape
    k, s, pad = 3, 2, 1
    Ho = (H + 2 * pad - k) // s + 1
    Wo = (W + 2 * pad - k) // s + 1
    xp = jnp.pad(x, ((0, 0), (pad, pad), (pad, pad), (0, 0)))
    out = None
    for i in range(k):
        for j in range(k):
            tap = xp[:, i:i + (Ho - 1) * s + 1:s, j:j + (Wo - 1) * s + 1:s, :]
            out = tap if out is None else jnp.maximum(out, tap)
    return out


def fused_head(x4, w1, sh1, w2, sh2, wh, bh):
    """GAP + derm_mlp + concatenated heads in one Pallas kernel (explicit VMEM)."""
    N, H, W, C = x4.shape
    Np = _round_up(max(N, 8), 8)
    xr = x4.reshape(N, H * W, C)
    if Np != N:
        xr = jnp.pad(xr, ((0, Np - N), (0, 0), (0, 0)))
    out = pl.pallas_call(
        _head_kernel,
        out_shape=jax.ShapeDtypeStruct((Np, wh.shape[1]), jnp.float32),
        in_specs=[pl.BlockSpec(memory_space=pltpu.MemorySpace.VMEM)
                  for _ in range(7)],
        out_specs=pl.BlockSpec(memory_space=pltpu.MemorySpace.VMEM),
    )(xr, w1, sh1, w2, sh2, wh, bh)
    return out[:N]


# ---------------------------------------------------------------------------
# Deterministic parameter construction (synthetic, no checkpoint)
# ---------------------------------------------------------------------------
_LAYER_CFG = (("layer1", 64, 64, 3, 1),
              ("layer2", 256, 128, 4, 2),
              ("layer3", 512, 256, 6, 2),
              ("layer4", 1024, 512, 3, 2))


class ParamGen:
    def __init__(self, seed):
        self.key = jax.random.PRNGKey(seed)

    def _next(self):
        self.key, sub = jax.random.split(self.key)
        return sub

    def conv(self, kh, kw, cin, cout):
        std = (2.0 / (kh * kw * cin)) ** 0.5
        return jax.random.normal(self._next(), (kh, kw, cin, cout), jnp.float32) * std

    def linear(self, fin, fout):
        std = (1.0 / fin) ** 0.5
        w = jax.random.normal(self._next(), (fin, fout), jnp.float32) * std
        b = jax.random.normal(self._next(), (fout,), jnp.float32) * std
        return w, b

    def bn(self, c):
        return dict(gamma=jnp.ones((c,), jnp.float32),
                    beta=jnp.zeros((c,), jnp.float32),
                    mean=jnp.zeros((c,), jnp.float32),
                    var=jnp.ones((c,), jnp.float32))


def make_bottleneck_params(pg, inplanes, width, stride):
    p = dict(
        conv1=pg.conv(1, 1, inplanes, width), bn1=pg.bn(width),
        conv2=pg.conv(3, 3, width, width), bn2=pg.bn(width),
        conv3=pg.conv(1, 1, width, width * 4), bn3=pg.bn(width * 4),
    )
    if stride != 1 or inplanes != width * 4:
        p["down_conv"] = pg.conv(1, 1, inplanes, width * 4)
        p["down_bn"] = pg.bn(width * 4)
    return p


def make_layer_params(pg, inplanes, width, blocks, stride):
    params = [make_bottleneck_params(pg, inplanes, width, stride)]
    for _ in range(blocks - 1):
        params.append(make_bottleneck_params(pg, width * 4, width, 1))
    return params


def make_model_params(class_list, seed=1):
    pg = ParamGen(seed)
    params = {"conv1": pg.conv(7, 7, 3, 64), "bn1": pg.bn(64)}
    for name, inplanes, width, blocks, stride in _LAYER_CFG:
        params[name] = make_layer_params(pg, inplanes, width, blocks, stride)
    # derm_mlp: Linear(2048,512)+BN+Swish+Dropout + Linear(512,128)+BN+Swish
    params["mlp_w1"], params["mlp_b1"] = pg.linear(2048, 512)
    params["mlp_bn1"] = pg.bn(512)
    params["mlp_w2"], params["mlp_b2"] = pg.linear(512, 128)
    params["mlp_bn2"] = pg.bn(128)
    # 9 derm heads: Linear(128, num_k)
    params["heads"] = [pg.linear(128, n) for n in class_list]
    return params


# ---------------------------------------------------------------------------
# BN folding into weights + lane-dense channel padding (done once, outside jit)
# ---------------------------------------------------------------------------
def _fold_conv(w_hwio, bn, cin_pad=None, cout_pad=None, eps=1e-5):
    kh, kw, cin, cout = w_hwio.shape
    scale = bn["gamma"] * jax.lax.rsqrt(bn["var"] + eps)
    shift = bn["beta"] - bn["mean"] * scale
    w = w_hwio * scale[None, None, None, :]
    cin_p = cin if cin_pad is None else cin_pad
    cout_p = cout if cout_pad is None else cout_pad
    if (cin_p, cout_p) != (cin, cout):
        w = jnp.pad(w, ((0, 0), (0, 0), (0, cin_p - cin), (0, cout_p - cout)))
        shift = jnp.pad(shift, (0, cout_p - cout))
    w2d = w.reshape(kh * kw * cin_p, cout_p)
    return w2d.astype(jnp.bfloat16), shift.astype(jnp.float32)


def _fold_linear(w, b, bn, eps=1e-5):
    scale = bn["gamma"] * jax.lax.rsqrt(bn["var"] + eps)
    shift = (b - bn["mean"]) * scale + bn["beta"]
    return ((w * scale[None, :]).astype(jnp.bfloat16),
            shift.reshape(1, -1).astype(jnp.float32))


def _prepare_bottleneck(p, inplanes, width):
    in_p = _cpad(inplanes)
    w_p = _cpad(width)
    out_c = width * 4                       # 256/512/1024/2048: already lane dense
    d = {}
    d["c1_w"], d["c1_sh"] = _fold_conv(p["conv1"], p["bn1"],
                                       cin_pad=in_p, cout_pad=w_p)
    d["c2_w"], d["c2_sh"] = _fold_conv(p["conv2"], p["bn2"],
                                       cin_pad=w_p, cout_pad=w_p)
    d["c3_w"], d["c3_sh"] = _fold_conv(p["conv3"], p["bn3"],
                                       cin_pad=w_p, cout_pad=out_c)
    if "down_conv" in p:
        d["down_w"], d["down_sh"] = _fold_conv(p["down_conv"], p["down_bn"],
                                               cin_pad=in_p, cout_pad=out_c)
        d["c3d_sh"] = d["c3_sh"] + d["down_sh"]   # combined epilogue shift
    return d


def prepare_params(params):
    prep = {}
    # stem: keep cin=3 (don't blow up K), pad cout 64 -> 128 (lane-dense output)
    prep["stem_w"], prep["stem_sh"] = _fold_conv(params["conv1"], params["bn1"],
                                                 cout_pad=_cpad(64))
    for name, inplanes, width, blocks, stride in _LAYER_CFG:
        blocks_p = []
        for bi, p in enumerate(params[name]):
            cin = inplanes if bi == 0 else width * 4
            blocks_p.append(_prepare_bottleneck(p, cin, width))
        prep[name] = blocks_p
    prep["mlp_w1"], prep["mlp_sh1"] = _fold_linear(
        params["mlp_w1"], params["mlp_b1"], params["mlp_bn1"])
    prep["mlp_w2"], prep["mlp_sh2"] = _fold_linear(
        params["mlp_w2"], params["mlp_b2"], params["mlp_bn2"])
    # concatenate the 9 heads into one lane-dense (128, 128) weight
    wh = jnp.concatenate([w for (w, _) in params["heads"]], axis=1)
    bh = jnp.concatenate([b for (_, b) in params["heads"]], axis=0)
    tot = wh.shape[1]
    hp = _round_up(max(tot, 128), 128)
    prep["head_w"] = jnp.pad(wh, ((0, 0), (0, hp - tot))).astype(jnp.bfloat16)
    prep["head_b"] = jnp.pad(bh, (0, hp - tot)).reshape(1, hp).astype(jnp.float32)
    return prep


# ---------------------------------------------------------------------------
# Forward pass
# ---------------------------------------------------------------------------
def bottleneck_forward(x, bp, stride):
    out = conv_prepared(x, bp["c1_w"], bp["c1_sh"],
                        kh=1, kw=1, stride=1, pad=0, act="relu")
    out = conv_prepared(out, bp["c2_w"], bp["c2_sh"],
                        kh=3, kw=3, stride=stride, pad=1, act="relu")
    Nb, Ho, Wo, Cm = out.shape

    if "down_w" in bp:
        # fused conv3 + downsample 1x1 (same output tile, f32 residual path)
        xs = x[:, ::stride, ::stride, :] if stride > 1 else x
        x1 = out.reshape(Nb * Ho * Wo, Cm)
        x2 = xs.reshape(Nb * Ho * Wo, xs.shape[-1])
        cout = bp["c3_w"].shape[1]
        y = fused_dual_matmul(x1, bp["c3_w"], x2, bp["down_w"], bp["c3d_sh"],
                              act="relu")
        if y is not None:
            return y.reshape(Nb, Ho, Wo, cout)
        # fallback (never taken for ResNet-50): two separate kernels
        identity = conv_prepared(x, bp["down_w"], bp["down_sh"],
                                 kh=1, kw=1, stride=stride, pad=0, act="none")
        return conv_prepared(out, bp["c3_w"], bp["c3_sh"],
                             kh=1, kw=1, stride=1, pad=0, act="relu",
                             residual=identity)

    # conv3 + folded BN + residual add + relu (fused epilogue)
    return conv_prepared(out, bp["c3_w"], bp["c3_sh"],
                         kh=1, kw=1, stride=1, pad=0, act="relu",
                         residual=x)


def resnet_uncertainty_derm_forward(prep, x_nchw, *, class_list):
    # PyTorch input is NCHW -> convert to NHWC bf16 for the kernels.
    x = jnp.transpose(x_nchw.astype(jnp.bfloat16), (0, 2, 3, 1))
    x = conv_prepared(x, prep["stem_w"], prep["stem_sh"],
                      kh=7, kw=7, stride=2, pad=3, act="relu")
    x = maxpool2d_3x3_s2(x)
    for name, _inpl, _w, _blk, lstride in _LAYER_CFG:
        for bi, bp in enumerate(prep[name]):
            x = bottleneck_forward(x, bp, lstride if bi == 0 else 1)
    # avgpool_derm + global_avg (both AdaptiveAvgPool2d((1,1))) == one GAP,
    # fused together with derm_mlp and the 9 heads (Dropout(0.8) == identity).
    out = fused_head(x, prep["mlp_w1"], prep["mlp_sh1"],
                     prep["mlp_w2"], prep["mlp_sh2"],
                     prep["head_w"], prep["head_b"])
    logits, off = [], 0
    for n in class_list:
        logits.append(out[:, off:off + n])
        off += n
    return [tuple(logits)]


# ---------------------------------------------------------------------------
if __name__ == "__main__":
    class_list = (5, 3, 2, 3, 2, 3, 2, 3, 2)  # (label,pn,str,pig,rs,dag,bwv,vs,uncertainty)

    # numerics check 1: fused matmul kernel vs XLA bf16 reference
    xk = jax.random.normal(jax.random.PRNGKey(1), (100, 200), jnp.float32)
    wk = jax.random.normal(jax.random.PRNGKey(2), (200, 128), jnp.float32)
    sk = jax.random.normal(jax.random.PRNGKey(3), (128,), jnp.float32)
    got = fused_matmul(xk, wk, sk, act="relu", out_dtype=jnp.float32)
    ref = jnp.maximum(
        jnp.dot(xk.astype(jnp.bfloat16), wk.astype(jnp.bfloat16),
                preferred_element_type=jnp.float32) + sk, 0.0)
    assert bool(jnp.allclose(got, ref, rtol=5e-2, atol=5e-1))

    # numerics check 2: fused conv3+downsample (dual matmul) kernel
    x1 = jax.random.normal(jax.random.PRNGKey(4), (64, 128), jnp.float32)
    w1d = jax.random.normal(jax.random.PRNGKey(5), (128, 256), jnp.float32) * 0.1
    x2 = jax.random.normal(jax.random.PRNGKey(6), (64, 256), jnp.float32)
    w2d = jax.random.normal(jax.random.PRNGKey(7), (256, 256), jnp.float32) * 0.1
    sd = jax.random.normal(jax.random.PRNGKey(8), (256,), jnp.float32)
    got2 = fused_dual_matmul(x1, w1d, x2, w2d, sd, act="relu",
                             out_dtype=jnp.float32)
    ref2 = jnp.maximum(
        jnp.dot(x1.astype(jnp.bfloat16), w1d.astype(jnp.bfloat16),
                preferred_element_type=jnp.float32)
        + jnp.dot(x2.astype(jnp.bfloat16), w2d.astype(jnp.bfloat16),
                  preferred_element_type=jnp.float32) + sd, 0.0)
    assert got2 is not None
    assert bool(jnp.allclose(got2, ref2, rtol=5e-2, atol=5e-1))

    params = make_model_params(class_list, seed=1)
    prep = prepare_params(params)

    key = jax.random.PRNGKey(0)
    x = jax.random.normal(key, (2, 3, 64, 64), jnp.float32)  # NCHW, like PyTorch

    fwd = jax.jit(functools.partial(resnet_uncertainty_derm_forward,
                                    class_list=class_list))
    out = fwd(prep, x)
    out = jax.block_until_ready(out)

    # sanity: one tuple of 9 logit tensors with the requested class counts
    assert len(out) == 1 and len(out[0]) == 9
    for logit, n in zip(out[0], class_list):
        assert logit.shape == (2, n)
        assert bool(jnp.all(jnp.isfinite(logit)))

    print("KERNEL_OK")
</pallas_src>

<mosaic_0001>
module attributes {stable_mosaic.version = 11 : i64} {
  func.func @_mm1_kernel(%arg0: i32, %arg1: i32, %arg2: memref<104x256xbf16, #tpu.memory_space<vmem>>, %arg3: memref<256x128xbf16, #tpu.memory_space<vmem>>, %arg4: memref<1x128xf32, #tpu.memory_space<vmem>>, %arg5: memref<104x128xf32, #tpu.memory_space<vmem>>) attributes {dimension_semantics = [#tpu.dimension_semantics<parallel>, #tpu.dimension_semantics<parallel>], iteration_bounds = array<i64: 1, 1>, scalar_prefetch = 0 : i64, scratch_operands = 0 : i64, tpu.core_type = #tpu.core_type<tc>, window_params = [{transform_indices = @transform_0, window_bounds = array<i64: 104, 256>}, {transform_indices = @transform_1, window_bounds = array<i64: 256, 128>}, {transform_indices = @transform_2, window_bounds = array<i64: 1, 128>}, {transform_indices = @transform_3, window_bounds = array<i64: 104, 128>}]} {
    %c0 = arith.constant 0 : index
    %c0_0 = arith.constant 0 : index
    %0 = vector.load %arg2[%c0, %c0_0] : memref<104x256xbf16, #tpu.memory_space<vmem>>, vector<104x256xbf16>
    %c0_1 = arith.constant 0 : index
    %c0_2 = arith.constant 0 : index
    %1 = vector.load %arg3[%c0_1, %c0_2] : memref<256x128xbf16, #tpu.memory_space<vmem>>, vector<256x128xbf16>
    %cst = arith.constant dense<0.000000e+00> : vector<104x128xf32>
    %2 = tpu.matmul %0, %1, %cst {dimension_numbers = #tpu.dot_dimension_numbers<[1], [0], [0], [1], [0, 0, 1, 1], [], []>} : vector<104x256xbf16>, vector<256x128xbf16>, vector<104x128xf32> -> vector<104x128xf32>
    %c0_3 = arith.constant 0 : index
    %c0_4 = arith.constant 0 : index
    %3 = vector.load %arg4[%c0_3, %c0_4] : memref<1x128xf32, #tpu.memory_space<vmem>>, vector<1x128xf32>
    %4 = vector.broadcast %3 : vector<1x128xf32> to vector<104x128xf32>
    %5 = arith.addf %2, %4 : vector<104x128xf32>
    %cst_5 = arith.constant 0.000000e+00 : f32
    %6 = vector.broadcast %cst_5 : f32 to vector<104x128xf32>
    %7 = arith.maximumf %5, %6 : vector<104x128xf32>
    %c0_6 = arith.constant 0 : index
    %c0_7 = arith.constant 0 : index
    %8 = vector.load %arg5[%c0_6, %c0_7] : memref<104x128xf32, #tpu.memory_space<vmem>>, vector<104x128xf32>
    tpu.vector_store %arg5[%c0_6, %c0_7], %7 {strides = array<i32>} : memref<104x128xf32, #tpu.memory_space<vmem>>, vector<104x128xf32>,
    return
  }
  func.func @transform_0(%arg0: i32, %arg1: i32) -> (i32, i32) {
    %c0_i32 = arith.constant 0 : i32
    %c0_i32_0 = arith.constant 0 : i32
    return %arg0, %c0_i32 : i32, i32
  }
  func.func @transform_1(%arg0: i32, %arg1: i32) -> (i32, i32) {
    %c0_i32 = arith.constant 0 : i32
    %c0_i32_0 = arith.constant 0 : i32
    return %c0_i32, %arg1 : i32, i32
  }
  func.func @transform_2(%arg0: i32, %arg1: i32) -> (i32, i32) {
    %c0_i32 = arith.constant 0 : i32
    %c0_i32_0 = arith.constant 0 : i32
    return %c0_i32, %arg1 : i32, i32
  }
  func.func @transform_3(%arg0: i32, %arg1: i32) -> (i32, i32) {
    %c0_i32 = arith.constant 0 : i32
    return %arg0, %arg1 : i32, i32
  }
}

</mosaic_0001>

<bundles_post_ra>
// kernel: tpu_custom_call.1
= control target key start
LH: loop header
LB: loop body
LE: loop exit
PB: predicated region body
PF: predicated region fallthrough
CT: control target
= control target key end

     0   :  { %8 = vsyncpa [#allocation3], 0  ;;  %s698_s0 = inlined_call_operand.hbm [shape: bf16[104,256], index: 0, kind: input, shape index: {}]   ;;  %s699_s1 = inlined_call_operand.hbm [shape: bf16[256,128], index: 1, kind: input, shape index: {}]   ;;  %s700_s2 = inlined_call_operand.vmem [shape: f32[1,128], index: 2, kind: input, shape index: {}]   ;;  %s701_s3 = inlined_call_operand.hbm [shape: f32[104,128], index: 3, kind: output, shape index: {}]  }
   0x1   :  { %9 = vsyncpa [#allocation6], 0 }
   0x2   :  { %10 = vsyncpa [#allocation4], 0  ;;  %s611_s12 = smov [#allocation2]   ;;  %s539_s16 = scalar_lea.hbm %s698_s0, 1664 }
   0x3   :  { %s16_s13 = sshll.u32 %s611_s12, 4  ;;  %p540_p0 = scmp.ne.s32.totalorder %s698_s0, %s539_s16  ;;  %s17_s13 = int_to_ptr.vmem [resolvable:$true] %s16_s13 }
   0x4   :  { %p543_p1 = scmp.lt.u32.totalorder %s539_s16, %s698_s0 }
   0x6   :  { %p545_p2 = pnand %p543_p1, %p540_p0 }
   0x8   :  { %548 = shalt.err (!%p545_p2)
}
   0x9   :  { %s549_s21 = scalar_lea.vmem %s17_s13, 1664  ;;  %p554_p4 = scmp.lt.s32.totalorder %s17_s13, %s17_s13 }
   0xa   :  { %p550_p3 = scmp.ne.s32.totalorder %s17_s13, %s549_s21  ;;  %p555_p5 = scmp.lt.s32.totalorder %s549_s21, %s549_s21 }
   0xc   :  { %p556_p6 = por %p555_p5, %p554_p4 }
   0xe   :  { %p557_p7 = pnand %p556_p6, %p550_p3 }
  0x10   :  { %560 = shalt.err (!%p557_p7)
}
  0x11   :  { %s612_s22 = smov 128   ;;  %s613_s23 = smov 8  }
  0x12   :  { %22 = dma.hbm_to_vmem [thread:$0]  %s698_s0, 1664, %s17_s13, [#allocation3], %s612_s22, %s612_s22, %s613_s23  }
  0x13   :  { %s614_s26 = smov [#allocation5]   ;;  %s561_s30 = scalar_lea.hbm %s699_s1, 2048 }
  0x14   :  { %s28_s27 = sshll.u32 %s614_s26, 4  ;;  %p562_p8 = scmp.ne.s32.totalorder %s699_s1, %s561_s30  ;;  %s29_s27 = int_to_ptr.vmem [resolvable:$true] %s28_s27 }
  0x15   :  { %p565_p9 = scmp.lt.u32.totalorder %s561_s30, %s699_s1 }
  0x17   :  { %p567_p10 = pnand %p565_p9, %p562_p8 }
  0x19   :  { %570 = shalt.err (!%p567_p10)
}
  0x1a   :  { %s571_s8 = scalar_lea.vmem %s29_s27, 2048  ;;  %p576_p12 = scmp.lt.s32.totalorder %s29_s27, %s29_s27 }
  0x1b   :  { %p572_p11 = scmp.ne.s32.totalorder %s29_s27, %s571_s8  ;;  %p577_p13 = scmp.lt.s32.totalorder %s571_s8, %s571_s8 }
  0x1d   :  { %p578_p0 = por %p577_p13, %p576_p12 }
  0x1f   :  { %p579_p1 = pnand %p578_p0, %p572_p11 }
  0x21   :  { %582 = shalt.err (!%p579_p1)
}
  0x22   :  { %s615_s0 = smov 64   ;;  %s616_s9 = smov 4  }
  0x23   :  { %34 = dma.hbm_to_vmem [thread:$0]  %s699_s1, 2048, %s29_s27, [#allocation6], %s615_s0, %s615_s0, %s616_s9  }
  0x24   :  { %605 = dma.done.wait [#allocation3], 1664  }
  0x25   :  { %606 = vsyncadd [#allocation3], 4294965632 }
  0x26   :  { %607 = dma.done.wait [#allocation6], 2048  }
  0x27   :  { %608 = vsyncadd [#allocation6], 4294965248  ;;  %v503_v0 = vld [vmem:[#allocation5 + $0x40] sm:$0xff]   ;;  %v505_v2 = vld [vmem:[#allocation5 + $0x48] sm:$0xff]  }
  0x28   :  { %v504_v1 = vld [vmem:[#allocation5] sm:$0xff]   ;;  %422 = vmatprep.subr.bf16.mxu0 %v503_v0  ;;  %480 = vmatprep.subr.bf16.mxu1 %v503_v0  ;;  %v506_v3 = vld [vmem:[#allocation5 + $0x8] sm:$0xff]   ;;  %v507_v4 = vld [vmem:[#allocation5 + $0x50] sm:$0xff]  }
  0x29   :  { %423 = vmatpush3.bf16.msra.mxu0 %v504_v1  ;;  %488 = vmatpush3.bf16.msra.mxu1 %v504_v1  ;;  %v508_v5 = vld [vmem:[#allocation5 + $0x10] sm:$0xff]   ;;  %v509_v6 = vld [vmem:[#allocation5 + $0x58] sm:$0xff]   ;;  %v511_v8 = vld [vmem:[#allocation5 + $0x60] sm:$0xff]  }
  0x2a   :  { %424 = vmatprep.subr.bf16.mxu0 %v505_v2  ;;  %481 = vmatprep.subr.bf16.mxu1 %v505_v2  ;;  %v510_v7 = vld [vmem:[#allocation5 + $0x18] sm:$0xff]   ;;  %v512_v9 = vld [vmem:[#allocation5 + $0x20] sm:$0xff]   ;;  %v513_v10 = vld [vmem:[#allocation5 + $0x68] sm:$0xff]  }
  0x2b   :  { %v521_v11 = vld [vmem:[#allocation2 + $0x4] ss:$8 sps:$4 sm:$0xff]   ;;  %v514_v13 = vld [vmem:[#allocation5 + $0x28] sm:$0xff]   ;;  %v515_v14 = vld [vmem:[#allocation5 + $0x70] sm:$0xff]  }
  0x2c   :  { %v524_v12 = vld [vmem:[#allocation2 + $0x44] ss:$8 sps:$4 sm:$0xff]   ;;  %291 = vmatprep.mubr.bf16.mxu0 %v521_v11  ;;  %v516_v15 = vld [vmem:[#allocation5 + $0x30] sm:$0xff]   ;;  %v519_v18 = vld [vmem:[#allocation2] ss:$8 sps:$4 sm:$0xff]  }
  0x2d   :  { %425 = vmatpush3.bf16.msra.mxu0 %v506_v3  ;;  %489 = vmatpush3.bf16.msra.mxu1 %v506_v3  ;;  %v517_v16 = vld [vmem:[#allocation5 + $0x78] sm:$0xff]   ;;  %v525_v20 = vld [vmem:[#allocation2 + $0x14] ss:$8 sps:$4 sm:$0xff]   ;;  %v527_v23 = vld [vmem:[#allocation2 + $0x10] ss:$8 sps:$4 sm:$0xff]  }
  0x2e   :  { %426 = vmatprep.subr.bf16.mxu0 %v507_v4  ;;  %482 = vmatprep.subr.bf16.mxu1 %v507_v4  ;;  %v518_v17 = vld [vmem:[#allocation5 + $0x38] sm:$0xff]   ;;  %v528_v21 = vld [vmem:[#allocation2 + $0x54] ss:$8 sps:$4 sm:$0xff]   ;;  %v532_v24 = vld [vmem:[#allocation2 + $0x50] ss:$8 sps:$4 sm:$0xff]  }
  0x2f   :  { %323 = vmatprep.mubr.bf16.mxu1 %v524_v12  ;;  %v522_v19 = vld [vmem:[#allocation2 + $0x40] ss:$8 sps:$4 sm:$0xff]   ;;  %v530_v25 = vld [vmem:[#allocation2 + $0x24] ss:$8 sps:$4 sm:$0xff]   ;;  %v535_v29 = vld [vmem:[#allocation2 + $0x34] ss:$8 sps:$4 sm:$0xff]  }
  0x30   :  { %v56_v22 = vld [vmem:[#allocation2 + $0x60] sm:$0xff]  ;;  %v538_v30 = vld [vmem:[#allocation2 + $0x30] ss:$8 sps:$4 sm:$0xff]  }
  0x31   :  { %427 = vmatpush3.bf16.msra.mxu0 %v508_v5  ;;  %490 = vmatpush3.bf16.msra.mxu1 %v508_v5  ;;  %v405_v26 = vcombine.high %v56_v22, %v56_v22  ;;  %v533_v27 = vld [vmem:[#allocation2 + $0x20] ss:$8 sps:$4 sm:$0xff]   ;;  %v404_v28 = vcombine.low %v56_v22, %v56_v22 }
  0x32   :  { %428 = vmatprep.subr.bf16.mxu0 %v509_v6  ;;  %483 = vmatprep.subr.bf16.mxu1 %v509_v6  ;;  %v668_v33 = vld [vmem:[%s700_s2] ss:$0 sm:$0xff]  ;;  %s617_s2 = smov [#allocation7]  }
  0x33   :  { %s378_s13 = sshll.u32 %s617_s2, 4  ;;  %s379_s13 = int_to_ptr.vmem [resolvable:$true] %s378_s13 }
  0x34   :  { %s583_s14 = scalar_lea.vmem %s379_s13, 1664  ;;  %p588_p3 = scmp.lt.s32.totalorder %s379_s13, %s379_s13 }
  0x35   :  { %429 = vmatpush3.bf16.msra.mxu0 %v510_v7  ;;  %491 = vmatpush3.bf16.msra.mxu1 %v510_v7  ;;  %p584_p2 = scmp.ne.s32.totalorder %s379_s13, %s583_s14  ;;  %p589_p4 = scmp.lt.s32.totalorder %s583_s14, %s583_s14 }
  0x36   :  { %430 = vmatprep.subr.bf16.mxu0 %v511_v8  ;;  %484 = vmatprep.subr.bf16.mxu1 %v511_v8 }
  0x37   :  { %p590_p5 = por %p589_p4, %p588_p3 }
  0x39   :  { %431 = vmatpush3.bf16.msra.mxu0 %v512_v9  ;;  %492 = vmatpush3.bf16.msra.mxu1 %v512_v9  ;;  %p591_p6 = pnand %p590_p5, %p584_p2 }
  0x3a   :  { %432 = vmatprep.subr.bf16.mxu0 %v513_v10  ;;  %485 = vmatprep.subr.bf16.mxu1 %v513_v10 }
  0x3d   :  { %433 = vmatpush3.bf16.msra.mxu0 %v514_v13  ;;  %493 = vmatpush3.bf16.msra.mxu1 %v514_v13 }
  0x3e   :  { %434 = vmatprep.subr.bf16.mxu0 %v515_v14  ;;  %486 = vmatprep.subr.bf16.mxu1 %v515_v14 }
  0x41   :  { %435 = vmatpush3.bf16.msra.mxu0 %v516_v15  ;;  %494 = vmatpush3.bf16.msra.mxu1 %v516_v15 }
  0x42   :  { %436 = vmatprep.subr.bf16.mxu0 %v517_v16  ;;  %487 = vmatprep.subr.bf16.mxu1 %v517_v16 }
  0x45   :  { %437 = vmatpush3.bf16.msra.mxu0 %v518_v17  ;;  %495 = vmatpush3.bf16.msra.mxu1 %v518_v17 }
  0x48   :  { %292 = vmatmul.mubr.bf16.vlgmr.msra.gmra.mrb[0].mxu0 %v519_v18  ;;  %324 = vmatmul.mubr.bf16.vlgmr.msra.gmra.mrb[0].mxu1 %v522_v19 }
  0x49   :  { %299 = vmatprep.mubr.bf16.mxu0 %v525_v20  ;;  %331 = vmatprep.mubr.bf16.mxu1 %v528_v21 }
  0x50   :  { %300 = vmatmul.mubr.bf16.gmra.mrb[4].mxu0 %v527_v23  ;;  %332 = vmatmul.mubr.bf16.gmra.mrb[4].mxu1 %v532_v24 }
  0x51   :  { %307 = vmatprep.mubr.bf16.mxu0 %v530_v25  ;;  %339 = vmatprep.mubr.bf16.mxu1 %v405_v26 }
  0x58   :  { %308 = vmatmul.mubr.bf16.gmra.mrb[8].mxu0 %v533_v27  ;;  %340 = vmatmul.mubr.bf16.gmra.mrb[8].mxu1 %v404_v28 }
  0x59   :  { %315 = vmatprep.mubr.bf16.mxu0 %v535_v29 }
  0x60   :  { %316 = vmatmul.mubr.bf16.gmra.mrb[12].mxu0 %v538_v30 }
 0x11b   :  { %v438_v31 = vpop.f32.mrb[0].mxu0  ;;  %v462_v32 = vpop.f32.mrb[0].mxu1 }
 0x11c   :  { %v439_v34 = vpop.f32.mrb[1].mxu0  ;;  %v463_v35 = vpop.f32.mrb[1].mxu1 }
 0x11d   :  { %v440_v36 = vadd.f32 %v439_v34, %v438_v31  ;;  %v441_v37 = vpop.f32.mrb[2].mxu0  ;;  %v464_v38 = vadd.f32 %v463_v35, %v462_v32  ;;  %v465_v39 = vpop.f32.mrb[2].mxu1 }
 0x11e   :  { %v442_v40 = vpop.f32.mrb[3].mxu0  ;;  %v466_v41 = vpop.f32.mrb[3].mxu1 }
 0x11f   :  { %v294_v42 = vadd.f32 %v440_v36, %v668_v33  ;;  %v443_v43 = vadd.f32 %v442_v40, %v441_v37  ;;  %v326_v44 = vadd.f32 %v464_v38, %v668_v33  ;;  %v467_v45 = vadd.f32 %v466_v41, %v465_v39 }
 0x121   :  { %v347_v46 = vmax.f32 %v294_v42, 0.0  ;;  %v297_v47 = vadd.f32 %v443_v43, %v668_v33  ;;  %v355_v48 = vmax.f32 %v326_v44, 0.0  ;;  %v329_v49 = vadd.f32 %v467_v45, %v668_v33 }
 0x123   :  { %360 = vst [vmem:[#allocation7] sm:$0xff] %v347_v46  ;;  %v348_v50 = vmax.f32 %v297_v47, 0.0  ;;  %v444_v51 = vpop.f32.mrb[4].mxu0  ;;  %368 = vst [vmem:[#allocation7 + $0x40] sm:$0xff] %v355_v48  ;;  %v356_v52 = vmax.f32 %v329_v49, 0.0  ;;  %v468_v53 = vpop.f32.mrb[4].mxu1 }
 0x124   :  { %v445_v54 = vpop.f32.mrb[5].mxu0  ;;  %v469_v55 = vpop.f32.mrb[5].mxu1 }
 0x125   :  { %361 = vst [vmem:[#allocation7 + $0x8] sm:$0xff] %v348_v50  ;;  %v446_v56 = vadd.f32 %v445_v54, %v444_v51  ;;  %v447_v57 = vpop.f32.mrb[6].mxu0  ;;  %369 = vst [vmem:[#allocation7 + $0x48] sm:$0xff] %v356_v52  ;;  %v470_v58 = vadd.f32 %v469_v55, %v468_v53  ;;  %v471_v59 = vpop.f32.mrb[6].mxu1 }
 0x126   :  { %v448_v60 = vpop.f32.mrb[7].mxu0  ;;  %v472_v61 = vpop.f32.mrb[7].mxu1 }
 0x127   :  { %v302_v62 = vadd.f32 %v446_v56, %v668_v33  ;;  %v449_v63 = vadd.f32 %v448_v60, %v447_v57  ;;  %v334_v0 = vadd.f32 %v470_v58, %v668_v33  ;;  %v473_v1 = vadd.f32 %v472_v61, %v471_v59 }
 0x129   :  { %v349_v2 = vmax.f32 %v302_v62, 0.0  ;;  %v305_v3 = vadd.f32 %v449_v63, %v668_v33  ;;  %v357_v4 = vmax.f32 %v334_v0, 0.0  ;;  %v337_v5 = vadd.f32 %v473_v1, %v668_v33 }
 0x12b   :  { %362 = vst [vmem:[#allocation7 + $0x10] sm:$0xff] %v349_v2  ;;  %v350_v6 = vmax.f32 %v305_v3, 0.0  ;;  %v450_v7 = vpop.f32.mrb[8].mxu0  ;;  %370 = vst [vmem:[#allocation7 + $0x50] sm:$0xff] %v357_v4  ;;  %v358_v8 = vmax.f32 %v337_v5, 0.0  ;;  %v474_v9 = vpop.f32.mrb[8].mxu1 }
 0x12c   :  { %v451_v10 = vpop.f32.mrb[9].mxu0  ;;  %v475_v11 = vpop.f32.mrb[9].mxu1 }
 0x12d   :  { %363 = vst [vmem:[#allocation7 + $0x18] sm:$0xff] %v350_v6  ;;  %v452_v12 = vadd.f32 %v451_v10, %v450_v7  ;;  %v453_v13 = vpop.f32.mrb[10].mxu0  ;;  %371 = vst [vmem:[#allocation7 + $0x58] sm:$0xff] %v358_v8  ;;  %v476_v14 = vadd.f32 %v475_v11, %v474_v9  ;;  %v477_v15 = vpop.f32.mrb[10].mxu1 }
 0x12e   :  { %v454_v16 = vpop.f32.mrb[11].mxu0  ;;  %v478_v17 = vpop.f32.mrb[11].mxu1 }
 0x12f   :  { %v310_v18 = vadd.f32 %v452_v12, %v668_v33  ;;  %v455_v19 = vadd.f32 %v454_v16, %v453_v13  ;;  %v342_v20 = vadd.f32 %v476_v14, %v668_v33 }
 0x131   :  { %v351_v21 = vmax.f32 %v310_v18, 0.0  ;;  %v313_v22 = vadd.f32 %v455_v19, %v668_v33  ;;  %v359_v23 = vmax.f32 %v342_v20, 0.0 }
 0x133   :  { %364 = vst [vmem:[#allocation7 + $0x20] sm:$0xff] %v351_v21  ;;  %v352_v24 = vmax.f32 %v313_v22, 0.0  ;;  %v456_v25 = vpop.f32.mrb[12].mxu0  ;;  %372 = vst [vmem:[#allocation7 + $0x60] sm:$0xff] %v359_v23 }
 0x134   :  { %v457_v26 = vpop.f32.mrb[13].mxu0 }
 0x135   :  { %365 = vst [vmem:[#allocation7 + $0x28] sm:$0xff] %v352_v24  ;;  %v458_v27 = vadd.f32 %v457_v26, %v456_v25  ;;  %v459_v28 = vpop.f32.mrb[14].mxu0 }
 0x136   :  { %v460_v29 = vpop.f32.mrb[15].mxu0 }
 0x137   :  { %v318_v30 = vadd.f32 %v458_v27, %v668_v33  ;;  %v461_v31 = vadd.f32 %v460_v29, %v459_v28 }
 0x139   :  { %v353_v32 = vmax.f32 %v318_v30, 0.0  ;;  %v321_v34 = vadd.f32 %v461_v31, %v668_v33 }
 0x13b   :  { %366 = vst [vmem:[#allocation7 + $0x30] sm:$0xff] %v353_v32  ;;  %v354_v35 = vmax.f32 %v321_v34, 0.0 }
 0x13d   :  { %367 = vst [vmem:[#allocation7 + $0x38] sm:$0xff] %v354_v35 }
 0x13e   :  { %594 = shalt.err (!%p591_p6)
}
 0x13f   :  { %s595_s17 = scalar_lea.hbm %s701_s3, 1664 }
 0x140   :  { %p596_p7 = scmp.ne.s32.totalorder %s701_s3, %s595_s17  ;;  %p599_p8 = scmp.lt.u32.totalorder %s595_s17, %s701_s3 }
 0x142   :  { %p601_p9 = pnand %p599_p8, %p596_p7 }
 0x144   :  { %604 = shalt.err (!%p601_p9)
}
 0x145   :  { %384 = dma.vmem_to_hbm [thread:$0]  %s379_s13, 1664, %s701_s3, [#allocation4], %s612_s22, %s612_s22, %s613_s23  }
 0x146   :  { %609 = dma.done.wait [#allocation4], 1664  }
 0x147   :  { %610 = vsyncadd [#allocation4], 4294965632 }
 0x148   :  { %388 = vsyncpa [#allocation3], 1 }
 0x149   :  { %389 = vsyncpa [#allocation6], 1 }
 0x14a   :  { %390 = vsyncpa [#allocation4], 1 }

</bundles_post_ra>
